<compile_context>
chip_gen: v7x
topology: tpu7x:2x2x1
jax: 0.10.0
libtpu: 0.0.40
codegen_flags: <defaults>
</compile_context>

<pallas_src>
import jax
import jax.numpy as jnp
from jax.experimental import pallas as pl
from jax.experimental.pallas import tpu as pltpu


def _round_up(n, m):
    return ((n + m - 1) // m) * m


def _choose_tiling(batch, tm_cap=1024):
    """Pick (tm, padded_batch, grid_b). Splits into >=2 tiles when possible so a
    'parallel' batch axis shards across both v7x TensorCores."""
    b8 = _round_up(batch, 8)
    if b8 >= 16:
        tm = min(tm_cap, _round_up((b8 + 1) // 2, 8))
    else:
        tm = b8
    b_p = _round_up(b8, tm)
    return tm, b_p, b_p // tm


def _resident_spec(shape):
    """BlockSpec for an operand that is constant across the grid (weights/biases):
    single-buffered — the second pipeline buffer would be dead VMEM."""
    index_map = lambda i: tuple(0 for _ in shape)
    try:
        return pl.BlockSpec(shape, index_map, pipeline_mode=pl.Buffered(1))
    except TypeError:  # older jax without pipeline_mode kwarg — fall back
        return pl.BlockSpec(shape, index_map)


def mlp_kernel(x_ref, w1_ref, b1_ref, w2_ref, b2_ref, o_ref):
    # Fully fused hot path: two MXU matmuls + f32 bias adds + ReLU, all in VMEM.
    x = x_ref[...].astype(w1_ref.dtype)                        # in-kernel bf16 cast
    h = jnp.dot(x, w1_ref[...], preferred_element_type=jnp.float32)
    h = jnp.maximum(h + b1_ref[...], 0.0)                      # bias + ReLU (f32)
    # Explicit choice: activations re-quantized to bf16 before the 2nd matmul.
    y = jnp.dot(h.astype(w2_ref.dtype), w2_ref[...],
                preferred_element_type=jnp.float32)
    y = y + b2_ref[...]
    o_ref[...] = y.astype(o_ref.dtype)                         # lane-dense bf16 store


def prepare_params(w1, b1, w2, b2, *, compute_dtype=jnp.bfloat16):
    """One-time parameter prep: pad every matmul dim to a multiple of 128 and cast
    weights to bf16. Zero padding preserves the math (padded hidden units are 0
    after ReLU and hit zero rows of W2). Call once, reuse across forwards."""
    d_in, d_hid = w1.shape
    d_out = w2.shape[1]
    d_in_p, d_hid_p, d_out_p = (_round_up(d, 128) for d in (d_in, d_hid, d_out))

    def pad_to(a, shape, dtype):
        a = a.astype(dtype)
        pads = tuple((0, s - n) for n, s in zip(a.shape, shape))
        return a if all(p == (0, 0) for p in pads) else jnp.pad(a, pads)

    w1_p = pad_to(w1, (d_in_p, d_hid_p), compute_dtype)
    b1_p = pad_to(b1.reshape(1, -1), (1, d_hid_p), jnp.float32)
    w2_p = pad_to(w2, (d_hid_p, d_out_p), compute_dtype)
    b2_p = pad_to(b2.reshape(1, -1), (1, d_out_p), jnp.float32)
    return (w1_p, b1_p, w2_p, b2_p), (d_in, d_hid, d_out)


def mlp_forward(x_nchw, params, logical_dims, *, tm_cap=1024):
    """x_nchw: [B, C, H, W]; params from prepare_params(); returns f32 logits [B, d_out]."""
    w1_p, b1_p, w2_p, b2_p = params
    d_in, d_hid, d_out = logical_dims
    d_in_p, d_hid_p = w1_p.shape
    d_out_p = w2_p.shape[1]

    B = x_nchw.shape[0]
    x = x_nchw.reshape(B, -1)                    # same as torch .view(B, -1), no copy
    tm, b_p, grid_b = _choose_tiling(B, tm_cap)

    # Only pad what actually needs it (no-op for 128-aligned d_in and B % tm == 0).
    pad_rows, pad_cols = b_p - B, d_in_p - d_in
    if pad_rows or pad_cols:
        x = jnp.pad(x, ((0, pad_rows), (0, pad_cols)))

    x_itemsize = jnp.dtype(x.dtype).itemsize
    w_itemsize = jnp.dtype(w1_p.dtype).itemsize
    bytes_accessed = (b_p * d_in_p * x_itemsize
                      + (w1_p.size + w2_p.size) * w_itemsize
                      + (b1_p.size + b2_p.size) * 4
                      + b_p * d_out_p * 2)                     # bf16 writeback
    cost = pl.CostEstimate(
        flops=2 * b_p * (d_in_p * d_hid_p + d_hid_p * d_out_p),
        transcendentals=0,
        bytes_accessed=bytes_accessed)

    out = pl.pallas_call(
        mlp_kernel,
        out_shape=jax.ShapeDtypeStruct((b_p, d_out_p), jnp.bfloat16),
        grid=(grid_b,),
        in_specs=[
            pl.BlockSpec((tm, d_in_p), lambda i: (i, 0)),      # batch-tiled x
            _resident_spec((d_in_p, d_hid_p)),                 # W1 resident, 1-buffered
            _resident_spec((1, d_hid_p)),                      # b1
            _resident_spec((d_hid_p, d_out_p)),                # W2
            _resident_spec((1, d_out_p)),                      # b2
        ],
        out_specs=pl.BlockSpec((tm, d_out_p), lambda i: (i, 0)),
        compiler_params=pltpu.CompilerParams(
            dimension_semantics=("parallel",),   # batch tiles shard across v7x's 2 TCs
            vmem_limit_bytes=32 * 1024 * 1024),
        cost_estimate=cost,
    )(x, w1_p, b1_p, w2_p, b2_p)

    # Single post-call copy: slice away padding and upcast bf16 -> f32 logits.
    return out[:B, :d_out].astype(jnp.float32)


def reference_forward_f32(x_nchw, w1, b1, w2, b2):
    x = x_nchw.reshape(x_nchw.shape[0], -1)
    h = jnp.maximum(x @ w1 + b1, 0.0)
    return h @ w2 + b2


def reference_forward_bf16(x_nchw, w1, b1, w2, b2):
    # Same numerics as the kernel (bf16 operands, f32 accumulation, bf16 writeback).
    x = x_nchw.reshape(x_nchw.shape[0], -1).astype(jnp.bfloat16)
    h = jnp.dot(x, w1.astype(jnp.bfloat16), preferred_element_type=jnp.float32)
    h = jnp.maximum(h + b1.astype(jnp.float32), 0.0)
    y = jnp.dot(h.astype(jnp.bfloat16), w2.astype(jnp.bfloat16),
                preferred_element_type=jnp.float32)
    y = y + b2.astype(jnp.float32)
    return y.astype(jnp.bfloat16).astype(jnp.float32)


if __name__ == "__main__":
    # Small shapes consistent with the module: batch=2, channels=4, spatial=16
    B, C, H, W = 2, 4, 16, 16
    input_dim = C * H * W          # 1024
    hidden_dim = 128
    output_dim = 10

    key = jax.random.PRNGKey(0)
    kx, k1, k2, k3, k4 = jax.random.split(key, 5)

    x = jax.random.normal(kx, (B, C, H, W), dtype=jnp.float32)
    # Deterministic parameter init (Kaiming-ish scaling), stored as [in, out].
    w1 = jax.random.normal(k1, (input_dim, hidden_dim), dtype=jnp.float32) * (1.0 / input_dim) ** 0.5
    b1 = jax.random.normal(k2, (hidden_dim,), dtype=jnp.float32) * 0.01
    w2 = jax.random.normal(k3, (hidden_dim, output_dim), dtype=jnp.float32) * (1.0 / hidden_dim) ** 0.5
    b2 = jax.random.normal(k4, (output_dim,), dtype=jnp.float32) * 0.01

    # Parameter prep happens ONCE (padding + bf16 cast hoisted out of the forward).
    params, dims = prepare_params(w1, b1, w2, b2)
    params = jax.block_until_ready(params)

    fwd = jax.jit(mlp_forward, static_argnames=("logical_dims", "tm_cap"))
    out = fwd(x, params, logical_dims=dims)
    out = jax.block_until_ready(out)
    assert out.shape == (B, output_dim)

    # Tight check against the matching bf16-with-f32-accumulation reference path.
    ref_bf16 = reference_forward_bf16(x, w1, b1, w2, b2)
    assert jnp.allclose(out, ref_bf16, atol=1e-2, rtol=1e-2), "mismatch vs bf16 reference"

    # Loose sanity check against the full-f32 reference (bf16 quantization error only).
    ref_f32 = reference_forward_f32(x, w1, b1, w2, b2)
    assert jnp.allclose(out, ref_f32, atol=1e-1, rtol=1e-1), "mismatch vs f32 reference"

    print("KERNEL_OK")
</pallas_src>

<mosaic_0001>
module attributes {stable_mosaic.version = 11 : i64} {
  func.func @mlp_kernel(%arg0: i32, %arg1: memref<8x1024xf32, #tpu.memory_space<vmem>>, %arg2: memref<1024x128xbf16, #tpu.memory_space<vmem>>, %arg3: memref<1x128xf32, #tpu.memory_space<vmem>>, %arg4: memref<128x128xbf16, #tpu.memory_space<vmem>>, %arg5: memref<1x128xf32, #tpu.memory_space<vmem>>, %arg6: memref<8x128xbf16, #tpu.memory_space<vmem>>) attributes {dimension_semantics = [#tpu.dimension_semantics<parallel>], iteration_bounds = array<i64: 1>, scalar_prefetch = 0 : i64, scratch_operands = 0 : i64, tpu.core_type = #tpu.core_type<tc>, window_params = [{transform_indices = @transform_0, window_bounds = array<i64: 8, 1024>}, {pipeline_mode = #tpu.pipeline_mode<synchronous>, transform_indices = @transform_1, window_bounds = array<i64: 1024, 128>}, {pipeline_mode = #tpu.pipeline_mode<synchronous>, transform_indices = @transform_2, window_bounds = array<i64: 1, 128>}, {pipeline_mode = #tpu.pipeline_mode<synchronous>, transform_indices = @transform_3, window_bounds = array<i64: 128, 128>}, {pipeline_mode = #tpu.pipeline_mode<synchronous>, transform_indices = @transform_4, window_bounds = array<i64: 1, 128>}, {transform_indices = @transform_5, window_bounds = array<i64: 8, 128>}]} {
    %c0 = arith.constant 0 : index
    %c0_0 = arith.constant 0 : index
    %0 = vector.load %arg1[%c0, %c0_0] : memref<8x1024xf32, #tpu.memory_space<vmem>>, vector<8x1024xf32>
    %1 = arith.truncf %0 : vector<8x1024xf32> to vector<8x1024xbf16>
    %c0_1 = arith.constant 0 : index
    %c0_2 = arith.constant 0 : index
    %2 = vector.load %arg2[%c0_1, %c0_2] : memref<1024x128xbf16, #tpu.memory_space<vmem>>, vector<1024x128xbf16>
    %cst = arith.constant dense<0.000000e+00> : vector<8x128xf32>
    %3 = tpu.matmul %1, %2, %cst {dimension_numbers = #tpu.dot_dimension_numbers<[1], [0], [0], [1], [0, 0, 1, 1], [], []>} : vector<8x1024xbf16>, vector<1024x128xbf16>, vector<8x128xf32> -> vector<8x128xf32>
    %c0_3 = arith.constant 0 : index
    %c0_4 = arith.constant 0 : index
    %4 = vector.load %arg3[%c0_3, %c0_4] : memref<1x128xf32, #tpu.memory_space<vmem>>, vector<1x128xf32>
    %5 = vector.broadcast %4 : vector<1x128xf32> to vector<8x128xf32>
    %6 = arith.addf %3, %5 : vector<8x128xf32>
    %cst_5 = arith.constant 0.000000e+00 : f32
    %7 = vector.broadcast %cst_5 : f32 to vector<8x128xf32>
    %8 = arith.maximumf %6, %7 : vector<8x128xf32>
    %9 = arith.truncf %8 : vector<8x128xf32> to vector<8x128xbf16>
    %c0_6 = arith.constant 0 : index
    %c0_7 = arith.constant 0 : index
    %10 = vector.load %arg4[%c0_6, %c0_7] : memref<128x128xbf16, #tpu.memory_space<vmem>>, vector<128x128xbf16>
    %cst_8 = arith.constant dense<0.000000e+00> : vector<8x128xf32>
    %11 = tpu.matmul %9, %10, %cst_8 {dimension_numbers = #tpu.dot_dimension_numbers<[1], [0], [0], [1], [0, 0, 1, 1], [], []>} : vector<8x128xbf16>, vector<128x128xbf16>, vector<8x128xf32> -> vector<8x128xf32>
    %c0_9 = arith.constant 0 : index
    %c0_10 = arith.constant 0 : index
    %12 = vector.load %arg5[%c0_9, %c0_10] : memref<1x128xf32, #tpu.memory_space<vmem>>, vector<1x128xf32>
    %13 = vector.broadcast %12 : vector<1x128xf32> to vector<8x128xf32>
    %14 = arith.addf %11, %13 : vector<8x128xf32>
    %15 = arith.truncf %14 : vector<8x128xf32> to vector<8x128xbf16>
    %c0_11 = arith.constant 0 : index
    %c0_12 = arith.constant 0 : index
    %16 = vector.load %arg6[%c0_11, %c0_12] : memref<8x128xbf16, #tpu.memory_space<vmem>>, vector<8x128xbf16>
    tpu.vector_store %arg6[%c0_11, %c0_12], %15 {strides = array<i32>} : memref<8x128xbf16, #tpu.memory_space<vmem>>, vector<8x128xbf16>,
    return
  }
  func.func @transform_0(%arg0: i32) -> (i32, i32) {
    %c0_i32 = arith.constant 0 : i32
    %c0_i32_0 = arith.constant 0 : i32
    return %arg0, %c0_i32 : i32, i32
  }
  func.func @transform_1(%arg0: i32) -> (i32, i32) {
    %c0_i32 = arith.constant 0 : i32
    %c0_i32_0 = arith.constant 0 : i32
    %c0_i32_1 = arith.constant 0 : i32
    return %c0_i32, %c0_i32_0 : i32, i32
  }
  func.func @transform_2(%arg0: i32) -> (i32, i32) {
    %c0_i32 = arith.constant 0 : i32
    %c0_i32_0 = arith.constant 0 : i32
    %c0_i32_1 = arith.constant 0 : i32
    return %c0_i32, %c0_i32_0 : i32, i32
  }
  func.func @transform_3(%arg0: i32) -> (i32, i32) {
    %c0_i32 = arith.constant 0 : i32
    %c0_i32_0 = arith.constant 0 : i32
    %c0_i32_1 = arith.constant 0 : i32
    return %c0_i32, %c0_i32_0 : i32, i32
  }
  func.func @transform_4(%arg0: i32) -> (i32, i32) {
    %c0_i32 = arith.constant 0 : i32
    %c0_i32_0 = arith.constant 0 : i32
    %c0_i32_1 = arith.constant 0 : i32
    return %c0_i32, %c0_i32_0 : i32, i32
  }
  func.func @transform_5(%arg0: i32) -> (i32, i32) {
    %c0_i32 = arith.constant 0 : i32
    %c0_i32_0 = arith.constant 0 : i32
    return %arg0, %c0_i32 : i32, i32
  }
}

</mosaic_0001>

<bundles_post_ra>
// kernel: mlp_forward.1
= control target key start
LH: loop header
LB: loop body
LE: loop exit
PB: predicated region body
PF: predicated region fallthrough
CT: control target
= control target key end

     0   :  { %10 = vsyncpa [#allocation3], 0  ;;  %s1142_s18 = smov [#allocation2]   ;;  %s1246_s0 = inlined_call_operand.vmem [shape: f32[8,1024], index: 0, kind: input, shape index: {}]   ;;  %s1247_s1 = inlined_call_operand.hbm [shape: bf16[1024,128], index: 1, kind: input, shape index: {}]   ;;  %s1248_s2 = inlined_call_operand.vmem [shape: f32[1,128], index: 2, kind: input, shape index: {}]   ;;  %s1249_s3 = inlined_call_operand.vmem [shape: bf16[128,128], index: 3, kind: input, shape index: {}]   ;;  %s1250_s4 = inlined_call_operand.vmem [shape: f32[1,128], index: 4, kind: input, shape index: {}]   ;;  %s1251_s5 = inlined_call_operand.vmem [shape: bf16[8,128], index: 5, kind: output, shape index: {}]  }
   0x1   :  { %s18_s19 = sshll.u32 %s1142_s18, 4  ;;  %s1118_s22 = scalar_lea.hbm %s1247_s1, 8192  ;;  %s19_s19 = int_to_ptr.vmem [resolvable:$true] %s18_s19 }
   0x2   :  { %p1119_p0 = scmp.ne.s32.totalorder %s1247_s1, %s1118_s22  ;;  %p1122_p1 = scmp.lt.u32.totalorder %s1118_s22, %s1247_s1 }
   0x4   :  { %p1124_p2 = pnand %p1122_p1, %p1119_p0 }
   0x6   :  { %1127 = shalt.err (!%p1124_p2)
}
   0x7   :  { %s1128_s27 = scalar_lea.vmem %s19_s19, 8192  ;;  %p1133_p4 = scmp.lt.s32.totalorder %s19_s19, %s19_s19 }
   0x8   :  { %p1129_p3 = scmp.ne.s32.totalorder %s19_s19, %s1128_s27  ;;  %p1134_p5 = scmp.lt.s32.totalorder %s1128_s27, %s1128_s27 }
   0xa   :  { %p1135_p6 = por %p1134_p5, %p1133_p4 }
   0xc   :  { %p1136_p7 = pnand %p1135_p6, %p1129_p3 }
   0xe   :  { %1139 = shalt.err (!%p1136_p7)
}
   0xf   :  { %s1143_s28 = smov 64   ;;  %s1144_s29 = smov 4  }
  0x10   :  { %24 = dma.hbm_to_vmem [thread:$0]  %s1247_s1, 8192, %s19_s19, [#allocation3], %s1143_s28, %s1143_s28, %s1144_s29  }
  0x11   :  { %1140 = dma.done.wait [#allocation3], 8192  }
  0x12   :  { %1141 = vsyncadd [#allocation3], 4294959104  ;;  %v1046_v0 = vld [vmem:[#allocation2 + $0x40] sm:$0xff]   ;;  %v1050_v4 = vld [vmem:[#allocation2 + $0x48] sm:$0xff]   ;;  %vm1146_vm0 = vmmov 0  }
  0x13   :  { %v1047_v1 = vld [vmem:[#allocation2 + $0xc0] sm:$0xff]   ;;  %924 = vmatprep.subr.bf16.mxu0 %v1046_v0  ;;  %v1051_v5 = vld [vmem:[#allocation2 + $0xc8] sm:$0xff]   ;;  %v1054_v8 = vld [vmem:[#allocation2 + $0x50] sm:$0xff]  }
  0x14   :  { %v1048_v2 = vld [vmem:[#allocation2] sm:$0xff]   ;;  %946 = vmatprep.subr.bf16.mxu1 %v1047_v1  ;;  %v1052_v6 = vld [vmem:[#allocation2 + $0x8] sm:$0xff]   ;;  %v1055_v9 = vld [vmem:[#allocation2 + $0xd0] sm:$0xff]  }
  0x15   :  { %v1049_v3 = vld [vmem:[#allocation2 + $0x80] sm:$0xff]   ;;  %925 = vmatpush3.bf16.msra.mxu0 %v1048_v2  ;;  %v1053_v7 = vld [vmem:[#allocation2 + $0x88] sm:$0xff]   ;;  %v1056_v10 = vld [vmem:[#allocation2 + $0x10] sm:$0xff]  }
  0x16   :  { %947 = vmatpush3.bf16.msra.mxu1 %v1049_v3  ;;  %926 = vmatprep.subr.bf16.mxu0 %v1050_v4  ;;  %v1057_v11 = vld [vmem:[#allocation2 + $0x90] sm:$0xff]   ;;  %v1058_v12 = vld [vmem:[#allocation2 + $0x58] sm:$0xff]   ;;  %v1062_v16 = vld [vmem:[#allocation2 + $0x60] sm:$0xff]  }
  0x17   :  { %948 = vmatprep.subr.bf16.mxu1 %v1051_v5  ;;  %v1059_v13 = vld [vmem:[#allocation2 + $0xd8] sm:$0xff]   ;;  %v1063_v17 = vld [vmem:[#allocation2 + $0xe0] sm:$0xff]   ;;  %v1066_v20 = vld [vmem:[#allocation2 + $0x68] sm:$0xff]  }
  0x18   :  { %v1060_v14 = vld [vmem:[#allocation2 + $0x18] sm:$0xff]   ;;  %v1064_v18 = vld [vmem:[#allocation2 + $0x20] sm:$0xff]   ;;  %v1067_v21 = vld [vmem:[#allocation2 + $0xe8] sm:$0xff]  }
  0x19   :  { %927 = vmatpush3.bf16.msra.mxu0 %v1052_v6  ;;  %v1061_v15 = vld [vmem:[#allocation2 + $0x98] sm:$0xff]   ;;  %v1065_v19 = vld [vmem:[#allocation2 + $0xa0] sm:$0xff]   ;;  %v1068_v22 = vld [vmem:[#allocation2 + $0x28] sm:$0xff]  }
  0x1a   :  { %949 = vmatpush3.bf16.msra.mxu1 %v1053_v7  ;;  %928 = vmatprep.subr.bf16.mxu0 %v1054_v8  ;;  %v1069_v23 = vld [vmem:[#allocation2 + $0xa8] sm:$0xff]   ;;  %v1070_v24 = vld [vmem:[#allocation2 + $0x70] sm:$0xff]   ;;  %v1074_v28 = vld [vmem:[#allocation2 + $0x78] sm:$0xff]  }
  0x1b   :  { %950 = vmatprep.subr.bf16.mxu1 %v1055_v9  ;;  %v1071_v25 = vld [vmem:[#allocation2 + $0xf0] sm:$0xff]   ;;  %v1075_v29 = vld [vmem:[#allocation2 + $0xf8] sm:$0xff]   ;;  %v36_v32 = vld [vmem:[%s1246_s0 + $0x8] sm:$0xff] }
  0x1c   :  { %v1072_v26 = vld [vmem:[#allocation2 + $0x30] sm:$0xff]   ;;  %v1076_v30 = vld [vmem:[#allocation2 + $0x38] sm:$0xff]   ;;  %v35_v34 = vld [vmem:[%s1246_s0] sm:$0xff]  ;;  %v44_v35 = vpack.c.bf16 %v36_v32, %v36_v32 }
  0x1d   :  { %929 = vmatpush3.bf16.msra.mxu0 %v1056_v10  ;;  %v1073_v27 = vld [vmem:[#allocation2 + $0xb0] sm:$0xff]   ;;  %v1077_v31 = vld [vmem:[#allocation2 + $0xb8] sm:$0xff]   ;;  %v43_v37 = vpack.c.bf16 %v35_v34, %v35_v34  ;;  %v1078_v40 = vld [vmem:[#allocation2 + $0x140] sm:$0xff]  }
  0x1e   :  { %951 = vmatpush3.bf16.msra.mxu1 %v1057_v11  ;;  %930 = vmatprep.subr.bf16.mxu0 %v1058_v12  ;;  %v38_v33 = vld [vmem:[%s1246_s0 + $0x18] sm:$0xff]  ;;  %v37_v38 = vld [vmem:[%s1246_s0 + $0x10] sm:$0xff]  ;;  %v1079_v41 = vld [vmem:[#allocation2 + $0x1c0] sm:$0xff]  }
  0x1f   :  { %952 = vmatprep.subr.bf16.mxu1 %v1059_v13  ;;  %v46_v36 = vpack.c.bf16 %v38_v33, %v38_v33  ;;  %v45_v39 = vpack.c.bf16 %v37_v38, %v37_v38  ;;  %602 = vmatprep.mubr.bf16.mxu0 %v44_v35  ;;  %v1080_v42 = vld [vmem:[#allocation2 + $0x100] sm:$0xff]   ;;  %v1082_v44 = vld [vmem:[#allocation2 + $0x148] sm:$0xff]   ;;  %v1086_v48 = vld [vmem:[#allocation2 + $0x150] sm:$0xff]  }
  0x20   :  { %v1081_v43 = vld [vmem:[#allocation2 + $0x180] sm:$0xff]   ;;  %v1083_v45 = vld [vmem:[#allocation2 + $0x1c8] sm:$0xff]   ;;  %v1087_v49 = vld [vmem:[#allocation2 + $0x1d0] sm:$0xff]  }
  0x21   :  { %931 = vmatpush3.bf16.msra.mxu0 %v1060_v14  ;;  %642 = vmatprep.mubr.bf16.mxu1 %v46_v36  ;;  %v1084_v46 = vld [vmem:[#allocation2 + $0x108] sm:$0xff]   ;;  %v1088_v50 = vld [vmem:[#allocation2 + $0x110] sm:$0xff]   ;;  %v1090_v52 = vld [vmem:[#allocation2 + $0x158] sm:$0xff]  }
  0x22   :  { %953 = vmatpush3.bf16.msra.mxu1 %v1061_v15  ;;  %932 = vmatprep.subr.bf16.mxu0 %v1062_v16  ;;  %v1085_v47 = vld [vmem:[#allocation2 + $0x188] sm:$0xff]   ;;  %v1089_v51 = vld [vmem:[#allocation2 + $0x190] sm:$0xff]   ;;  %v1091_v53 = vld [vmem:[#allocation2 + $0x1d8] sm:$0xff]  }
  0x23   :  { %954 = vmatprep.subr.bf16.mxu1 %v1063_v17  ;;  %v1092_v54 = vld [vmem:[#allocation2 + $0x118] sm:$0xff]   ;;  %v1094_v56 = vld [vmem:[#allocation2 + $0x160] sm:$0xff]   ;;  %v1098_v60 = vld [vmem:[#allocation2 + $0x168] sm:$0xff]   ;;  %v1145_v17 = vmov 0.0  }
  0x24   :  { %v1093_v55 = vld [vmem:[#allocation2 + $0x198] sm:$0xff]   ;;  %v1095_v57 = vld [vmem:[#allocation2 + $0x1e0] sm:$0xff]   ;;  %v1099_v61 = vld [vmem:[#allocation2 + $0x1e8] sm:$0xff]  }
  0x25   :  { %933 = vmatpush3.bf16.msra.mxu0 %v1064_v18  ;;  %v1096_v58 = vld [vmem:[#allocation2 + $0x120] sm:$0xff]   ;;  %v1100_v62 = vld [vmem:[#allocation2 + $0x128] sm:$0xff]   ;;  %v1102_v0 = vld [vmem:[#allocation2 + $0x170] sm:$0xff]  }
  0x26   :  { %955 = vmatpush3.bf16.msra.mxu1 %v1065_v19  ;;  %934 = vmatprep.subr.bf16.mxu0 %v1066_v20  ;;  %v1097_v59 = vld [vmem:[#allocation2 + $0x1a0] sm:$0xff]   ;;  %v1101_v63 = vld [vmem:[#allocation2 + $0x1a8] sm:$0xff]   ;;  %v1103_v1 = vld [vmem:[#allocation2 + $0x1f0] sm:$0xff]  }
  0x27   :  { %956 = vmatprep.subr.bf16.mxu1 %v1067_v21  ;;  %v1104_v2 = vld [vmem:[#allocation2 + $0x130] sm:$0xff]   ;;  %v1106_v4 = vld [vmem:[#allocation2 + $0x178] sm:$0xff]   ;;  %v40_v8 = vld [vmem:[%s1246_s0 + $0x28] sm:$0xff] }
  0x28   :  { %v1105_v3 = vld [vmem:[#allocation2 + $0x1b0] sm:$0xff]   ;;  %v1107_v5 = vld [vmem:[#allocation2 + $0x1f8] sm:$0xff]   ;;  %v48_v10 = vpack.c.bf16 %v40_v8, %v40_v8  ;;  %v39_v12 = vld [vmem:[%s1246_s0 + $0x20] sm:$0xff] }
  0x29   :  { %935 = vmatpush3.bf16.msra.mxu0 %v1068_v22  ;;  %v1108_v6 = vld [vmem:[#allocation2 + $0x138] sm:$0xff]   ;;  %v41_v13 = vld [vmem:[%s1246_s0 + $0x30] sm:$0xff]  ;;  %v47_v14 = vpack.c.bf16 %v39_v12, %v39_v12  ;;  %v1110_v16 = vld [vmem:[%s1249_s3] sm:$0xff]  }
  0x2a   :  { %957 = vmatpush3.bf16.msra.mxu1 %v1069_v23  ;;  %936 = vmatprep.subr.bf16.mxu0 %v1070_v24  ;;  %v1109_v7 = vld [vmem:[#allocation2 + $0x1b8] sm:$0xff]   ;;  %v49_v15 = vpack.c.bf16 %v41_v13, %v41_v13  ;;  %v1111_v18 = vld [vmem:[%s1249_s3 + $0x8] sm:$0xff]   ;;  %v1112_v19 = vld [vmem:[%s1249_s3 + $0x10] sm:$0xff]  }
  0x2b   :  { %958 = vmatprep.subr.bf16.mxu1 %v1071_v25  ;;  %v42_v9 = vld [vmem:[%s1246_s0 + $0x38] sm:$0xff]  ;;  %v1114_v21 = vld [vmem:[%s1249_s3 + $0x20] sm:$0xff]   ;;  %v1115_v22 = vld [vmem:[%s1249_s3 + $0x28] sm:$0xff]  }
  0x2c   :  { %v50_v11 = vpack.c.bf16 %v42_v9, %v42_v9  ;;  %v1113_v20 = vld [vmem:[%s1249_s3 + $0x18] sm:$0xff]   ;;  %v1116_v23 = vld [vmem:[%s1249_s3 + $0x30] sm:$0xff]  }
  0x2d   :  { %937 = vmatpush3.bf16.msra.mxu0 %v1072_v26  ;;  %v1117_v24 = vld [vmem:[%s1249_s3 + $0x38] sm:$0xff]  }
  0x2e   :  { %959 = vmatpush3.bf16.msra.mxu1 %v1073_v27  ;;  %938 = vmatprep.subr.bf16.mxu0 %v1074_v28  ;;  %v850_v27 = vld [vmem:[%s1248_s2] ss:$0 sm:$0xff] }
  0x2f   :  { %960 = vmatprep.subr.bf16.mxu1 %v1075_v29 }
  0x31   :  { %939 = vmatpush3.bf16.msra.mxu0 %v1076_v30 }
  0x32   :  { %961 = vmatpush3.bf16.msra.mxu1 %v1077_v31  ;;  %968 = vmatprep.subr.bf16.mxu0 %v1078_v40 }
  0x33   :  { %990 = vmatprep.subr.bf16.mxu1 %v1079_v41 }
  0x34   :  { %603 = vmatmul.mubr.bf16.vlgmr.msra.gmra.mrb[0].mxu0 %v43_v37 }
  0x35   :  { %643 = vmatmul.mubr.bf16.vlgmr.msra.gmra.mrb[0].mxu1 %v45_v39  ;;  %969 = vmatpush3.bf16.msra.mxu0 %v1080_v42 }
  0x36   :  { %991 = vmatpush3.bf16.msra.mxu1 %v1081_v43  ;;  %970 = vmatprep.subr.bf16.mxu0 %v1082_v44 }
  0x37   :  { %992 = vmatprep.subr.bf16.mxu1 %v1083_v45  ;;  %682 = vmatprep.mubr.bf16.mxu0 %v48_v10 }
  0x38   :  { %722 = vmatprep.mubr.bf16.mxu1 %v50_v11 }
  0x39   :  { %971 = vmatpush3.bf16.msra.mxu0 %v1084_v46 }
  0x3a   :  { %993 = vmatpush3.bf16.msra.mxu1 %v1085_v47  ;;  %972 = vmatprep.subr.bf16.mxu0 %v1086_v48 }
  0x3b   :  { %994 = vmatprep.subr.bf16.mxu1 %v1087_v49 }
  0x3d   :  { %973 = vmatpush3.bf16.msra.mxu0 %v1088_v50 }
  0x3e   :  { %995 = vmatpush3.bf16.msra.mxu1 %v1089_v51  ;;  %974 = vmatprep.subr.bf16.mxu0 %v1090_v52  ;;  %v915_v52 = vld [vmem:[%s1250_s4] ss:$0 sm:$0xff] }
  0x3f   :  { %996 = vmatprep.subr.bf16.mxu1 %v1091_v53 }
  0x41   :  { %975 = vmatpush3.bf16.msra.mxu0 %v1092_v54 }
  0x42   :  { %997 = vmatpush3.bf16.msra.mxu1 %v1093_v55  ;;  %976 = vmatprep.subr.bf16.mxu0 %v1094_v56 }
  0x43   :  { %998 = vmatprep.subr.bf16.mxu1 %v1095_v57 }
  0x45   :  { %977 = vmatpush3.bf16.msra.mxu0 %v1096_v58 }
  0x46   :  { %999 = vmatpush3.bf16.msra.mxu1 %v1097_v59  ;;  %978 = vmatprep.subr.bf16.mxu0 %v1098_v60 }
  0x47   :  { %1000 = vmatprep.subr.bf16.mxu1 %v1099_v61 }
  0x49   :  { %979 = vmatpush3.bf16.msra.mxu0 %v1100_v62 }
  0x4a   :  { %1001 = vmatpush3.bf16.msra.mxu1 %v1101_v63  ;;  %980 = vmatprep.subr.bf16.mxu0 %v1102_v0 }
  0x4b   :  { %1002 = vmatprep.subr.bf16.mxu1 %v1103_v1 }
  0x4d   :  { %981 = vmatpush3.bf16.msra.mxu0 %v1104_v2 }
  0x4e   :  { %1003 = vmatpush3.bf16.msra.mxu1 %v1105_v3  ;;  %982 = vmatprep.subr.bf16.mxu0 %v1106_v4 }
  0x4f   :  { %1004 = vmatprep.subr.bf16.mxu1 %v1107_v5 }
  0x51   :  { %983 = vmatpush3.bf16.msra.mxu0 %v1108_v6 }
  0x52   :  { %1005 = vmatpush3.bf16.msra.mxu1 %v1109_v7  ;;  %1021 = vmatprep.subr.bf16.mxu0 %v1145_v17 }
  0x54   :  { %683 = vmatmul.mubr.bf16.vlgmr.msra.gmra.mrb[4].mxu0 %v47_v14 }
  0x55   :  { %723 = vmatmul.mubr.bf16.vlgmr.msra.gmra.mrb[4].mxu1 %v49_v15  ;;  %1022 = vmatpush3.bf16.msra.mxu0 %v1110_v16 }
  0x56   :  { %1023 = vmatprep.subr.bf16.mxu0 %v1145_v17  ;;  %1037 = vmatprep.mubr.msk.bf16.mxu0 %vm1146_vm0, %v1145_v17 }
  0x59   :  { %1024 = vmatpush3.bf16.msra.mxu0 %v1111_v18 }
  0x5a   :  { %1025 = vmatprep.subr.bf16.mxu0 %v1145_v17 }
  0x5d   :  { %1026 = vmatpush3.bf16.msra.mxu0 %v1112_v19 }
  0x5e   :  { %1027 = vmatprep.subr.bf16.mxu0 %v1145_v17 }
  0x61   :  { %1028 = vmatpush3.bf16.msra.mxu0 %v1113_v20 }
  0x62   :  { %1029 = vmatprep.subr.bf16.mxu0 %v1145_v17 }
  0x65   :  { %1030 = vmatpush3.bf16.msra.mxu0 %v1114_v21 }
  0x66   :  { %1031 = vmatprep.subr.bf16.mxu0 %v1145_v17 }
  0x69   :  { %1032 = vmatpush3.bf16.msra.mxu0 %v1115_v22 }
  0x6a   :  { %1033 = vmatprep.subr.bf16.mxu0 %v1145_v17 }
  0x6d   :  { %1034 = vmatpush3.bf16.msra.mxu0 %v1116_v23 }
  0x6e   :  { %1035 = vmatprep.subr.bf16.mxu0 %v1145_v17 }
  0x71   :  { %1036 = vmatpush3.bf16.msra.mxu0 %v1117_v24 }
 0x107   :  { %v940_v25 = vpop.f32.mrb[0].mxu0 }
 0x108   :  { %v962_v26 = vpop.f32.mrb[0].mxu1  ;;  %v941_v28 = vpop.f32.mrb[1].mxu0 }
 0x109   :  { %v963_v29 = vpop.f32.mrb[1].mxu1  ;;  %v942_v30 = vadd.f32 %v941_v28, %v940_v25  ;;  %v943_v32 = vpop.f32.mrb[2].mxu0 }
 0x10a   :  { %v964_v31 = vadd.f32 %v963_v29, %v962_v26  ;;  %v965_v33 = vpop.f32.mrb[2].mxu1  ;;  %v944_v34 = vpop.f32.mrb[3].mxu0 }
 0x10b   :  { %v966_v35 = vpop.f32.mrb[3].mxu1  ;;  %v605_v36 = vadd.f32 %v942_v30, %v850_v27 }
 0x10d   :  { %v645_v37 = vadd.f32 %v964_v31, %v605_v36 }
 0x127   :  { %v984_v38 = vpop.f32.mrb[4].mxu0 }
 0x128   :  { %v1006_v39 = vpop.f32.mrb[4].mxu1  ;;  %v985_v40 = vpop.f32.mrb[5].mxu0 }
 0x129   :  { %v986_v41 = vadd.f32 %v985_v40, %v984_v38  ;;  %v1007_v42 = vpop.f32.mrb[5].mxu1  ;;  %v987_v43 = vpop.f32.mrb[6].mxu0 }
 0x12a   :  { %v1008_v44 = vadd.f32 %v1007_v42, %v1006_v39  ;;  %v1009_v45 = vpop.f32.mrb[6].mxu1  ;;  %v988_v46 = vpop.f32.mrb[7].mxu0 }
 0x12b   :  { %v685_v47 = vadd.f32 %v986_v41, %v645_v37  ;;  %v1010_v48 = vpop.f32.mrb[7].mxu1 }
 0x12d   :  { %v725_v49 = vadd.f32 %v1008_v44, %v685_v47 }
 0x12f   :  { %v730_v50 = vmax.f32 %v725_v49, 0.0 }
 0x131   :  { %v731_v51 = vpack.c.bf16 %v730_v50, %v730_v50 }
 0x133   :  { %1038 = vmatmul.mubr.bf16.vlgmr.msra.gmra.mrb[8].mxu0 %v731_v51 }
 0x206   :  { %v837_v53 = vpop.f32.mrb[8].mxu0 }
 0x207   :  { %v838_v54 = vadd.f32 %v915_v52, %v837_v53  ;;  %v1039_v55 = vpop.f32.mrb[9].mxu0 }
 0x208   :  { %v840_v56 = vpop.f32.mrb[10].mxu0 }
 0x209   :  { %v843_v57 = vpack.c.bf16 %v838_v54, %v838_v54  ;;  %v1040_v58 = vpop.f32.mrb[11].mxu0 }
 0x20b   :  { %844 = vst [vmem:[%s1251_s5] sm:$0xf] %v843_v57 }
 0x20c   :  { %849 = vsyncpa [#allocation3], 1 }

</bundles_post_ra>
